<compile_context>
chip_gen: v7x
topology: tpu7x:2x2x1
jax: 0.10.0
libtpu: 0.0.40
codegen_flags: <defaults>
</compile_context>

<pallas_src>
import jax
import jax.numpy as jnp
from jax.experimental import pallas as pl
from jax.experimental.pallas import tpu as pltpu

STATE_DIM = 4      # CartPole-v0 observation dim
HIDDEN_DIM = 128
OUT_DIM = 1        # ValueNet: one scalar value per state


def value_net_kernel(xT_ref, w1_ref, b1_ref, w2_ref, b2_ref, outT_ref):
    """Fused fc1 -> ReLU -> fc2 on a transposed (batch-on-lanes) tile.

    xT_ref   : [S, TB]  states, batch on the lane axis
    w1_ref   : [H, S]   torch fc1.weight (native [out, in] layout)
    b1_ref   : [H, 1]   torch fc1.bias, broadcast along lanes
    w2_ref   : [1, H]   torch fc2.weight
    b2_ref   : [1, 1]   torch fc2.bias
    outT_ref : [1, TB]  values, batch on the lane axis (lane-dense store)
    """
    xT = xT_ref[...]                                                     # [S, TB]
    # fc1 + bias + ReLU  (MXU matmul, f32 accumulate; bias/ReLU on the VPU)
    hT = jnp.dot(w1_ref[...], xT, preferred_element_type=jnp.float32)    # [H, TB]
    hT = jnp.maximum(hT + b1_ref[...], 0.0)
    # fc2 + bias
    vT = jnp.dot(w2_ref[...], hT, preferred_element_type=jnp.float32)    # [1, TB]
    outT_ref[...] = (vT + b2_ref[...]).astype(outT_ref.dtype)


def value_net_forward(x, w1, b1, w2, b2, *, block_b=1024):
    """x: [B, STATE_DIM] f32 -> values: [B, 1] f32.  Weights in torch [out, in] layout."""
    B, S = x.shape
    H = w1.shape[0]

    # Batch lives on the lane axis -> tile must be a multiple of 128.
    tb = min(block_b, pl.cdiv(B, 128) * 128)
    tb = max(128, (tb // 128) * 128)
    b_pad = pl.cdiv(B, tb) * tb

    # Transpose once in the wrapper (layout plumbing, not compute) and zero-pad
    # the batch to a whole number of lane tiles; padded columns are sliced off.
    xT = jnp.zeros((S, b_pad), x.dtype).at[:, :B].set(x.T)
    b1c = b1.reshape(H, 1)
    b2c = b2.reshape(OUT_DIM, 1)

    grid = (b_pad // tb,)
    flops = 2 * b_pad * (S * H + H * OUT_DIM)
    bytes_accessed = 4 * (b_pad * S + b_pad * OUT_DIM            # activations in/out
                          + H * S + H + OUT_DIM * H + OUT_DIM)   # weights + biases

    outT = pl.pallas_call(
        value_net_kernel,
        out_shape=jax.ShapeDtypeStruct((OUT_DIM, b_pad), jnp.float32),
        grid=grid,
        in_specs=[
            pl.BlockSpec((S, tb), lambda i: (0, i)),          # xT: tiled along batch/lanes
            pl.BlockSpec((H, S), lambda i: (0, 0)),           # W1: grid-invariant
            pl.BlockSpec((H, 1), lambda i: (0, 0)),           # b1
            pl.BlockSpec((OUT_DIM, H), lambda i: (0, 0)),     # W2
            pl.BlockSpec((OUT_DIM, 1), lambda i: (0, 0)),     # b2
        ],
        out_specs=pl.BlockSpec((OUT_DIM, tb), lambda i: (0, i)),
        compiler_params=pltpu.CompilerParams(
            # batch tiles are independent -> megacore-shardable on v7x
            dimension_semantics=("parallel",),
        ),
        cost_estimate=pl.CostEstimate(
            flops=flops, transcendentals=0, bytes_accessed=bytes_accessed),
    )(xT, w1, b1c, w2, b2c)

    return outT[:, :B].T   # back to [B, 1]


def init_params(key):
    """Deterministic PyTorch-Linear-style init: U(-1/sqrt(fan_in), 1/sqrt(fan_in)).

    Weights are kept in torch's native [out, in] layout, which is exactly what the
    transposed kernel consumes (no per-call transposes anywhere).
    """
    k1, k2, k3, k4 = jax.random.split(key, 4)
    bound1 = 1.0 / jnp.sqrt(jnp.float32(STATE_DIM))
    bound2 = 1.0 / jnp.sqrt(jnp.float32(HIDDEN_DIM))
    w1 = jax.random.uniform(k1, (HIDDEN_DIM, STATE_DIM), jnp.float32,
                            minval=-bound1, maxval=bound1)
    b1 = jax.random.uniform(k2, (HIDDEN_DIM,), jnp.float32,
                            minval=-bound1, maxval=bound1)
    w2 = jax.random.uniform(k3, (OUT_DIM, HIDDEN_DIM), jnp.float32,
                            minval=-bound2, maxval=bound2)
    b2 = jax.random.uniform(k4, (OUT_DIM,), jnp.float32,
                            minval=-bound2, maxval=bound2)
    return w1, b1, w2, b2


if __name__ == "__main__":
    key = jax.random.PRNGKey(0)
    k_params, k_x = jax.random.split(key)

    w1, b1, w2, b2 = init_params(k_params)

    batch = 8
    x = jax.random.normal(k_x, (batch, STATE_DIM), jnp.float32)

    values = value_net_forward(x, w1, b1, w2, b2)
    values = jax.block_until_ready(values)

    assert values.shape == (batch, OUT_DIM)

    # cross-check against pure-JAX reference (torch nn.Linear semantics)
    ref = jnp.maximum(x @ w1.T + b1, 0.0) @ w2.T + b2
    assert bool(jnp.all(jnp.abs(values - ref) < 1e-5))

    print("KERNEL_OK")
</pallas_src>

<mosaic_0001>
module attributes {stable_mosaic.version = 11 : i64} {
  func.func @value_net_kernel(%arg0: i32, %arg1: memref<4x128xf32, #tpu.memory_space<vmem>>, %arg2: memref<128x4xf32, #tpu.memory_space<vmem>>, %arg3: memref<128x1xf32, #tpu.memory_space<vmem>>, %arg4: memref<1x128xf32, #tpu.memory_space<vmem>>, %arg5: memref<1x1xf32, #tpu.memory_space<vmem>>, %arg6: memref<1x128xf32, #tpu.memory_space<vmem>>) attributes {dimension_semantics = [#tpu.dimension_semantics<parallel>], iteration_bounds = array<i64: 1>, scalar_prefetch = 0 : i64, scratch_operands = 0 : i64, tpu.core_type = #tpu.core_type<tc>, window_params = [{transform_indices = @transform_0, window_bounds = array<i64: 4, 128>}, {pipeline_mode = #tpu.pipeline_mode<synchronous>, transform_indices = @transform_1, window_bounds = array<i64: 128, 4>}, {pipeline_mode = #tpu.pipeline_mode<synchronous>, transform_indices = @transform_2, window_bounds = array<i64: 128, 1>}, {pipeline_mode = #tpu.pipeline_mode<synchronous>, transform_indices = @transform_3, window_bounds = array<i64: 1, 128>}, {pipeline_mode = #tpu.pipeline_mode<synchronous>, transform_indices = @transform_4, window_bounds = array<i64: 1, 1>}, {transform_indices = @transform_5, window_bounds = array<i64: 1, 128>}]} {
    %c0 = arith.constant 0 : index
    %c0_0 = arith.constant 0 : index
    %0 = vector.load %arg1[%c0, %c0_0] : memref<4x128xf32, #tpu.memory_space<vmem>>, vector<4x128xf32>
    %c0_1 = arith.constant 0 : index
    %c0_2 = arith.constant 0 : index
    %1 = vector.load %arg2[%c0_1, %c0_2] : memref<128x4xf32, #tpu.memory_space<vmem>>, vector<128x4xf32>
    %cst = arith.constant dense<0.000000e+00> : vector<128x128xf32>
    %2 = tpu.matmul %1, %0, %cst {dimension_numbers = #tpu.dot_dimension_numbers<[1], [0], [0], [1], [0, 0, 1, 1], [], []>} : vector<128x4xf32>, vector<4x128xf32>, vector<128x128xf32> -> vector<128x128xf32>
    %c0_3 = arith.constant 0 : index
    %c0_4 = arith.constant 0 : index
    %3 = vector.load %arg3[%c0_3, %c0_4] : memref<128x1xf32, #tpu.memory_space<vmem>>, vector<128x1xf32>
    %4 = vector.broadcast %3 : vector<128x1xf32> to vector<128x128xf32>
    %5 = arith.addf %2, %4 : vector<128x128xf32>
    %cst_5 = arith.constant 0.000000e+00 : f32
    %6 = vector.broadcast %cst_5 : f32 to vector<128x128xf32>
    %7 = arith.maximumf %5, %6 : vector<128x128xf32>
    %c0_6 = arith.constant 0 : index
    %c0_7 = arith.constant 0 : index
    %8 = vector.load %arg4[%c0_6, %c0_7] : memref<1x128xf32, #tpu.memory_space<vmem>>, vector<1x128xf32>
    %cst_8 = arith.constant dense<0.000000e+00> : vector<1x128xf32>
    %9 = tpu.matmul %8, %7, %cst_8 {dimension_numbers = #tpu.dot_dimension_numbers<[1], [0], [0], [1], [0, 0, 1, 1], [], []>} : vector<1x128xf32>, vector<128x128xf32>, vector<1x128xf32> -> vector<1x128xf32>
    %c0_9 = arith.constant 0 : index
    %c0_10 = arith.constant 0 : index
    %10 = vector.load %arg5[%c0_9, %c0_10] : memref<1x1xf32, #tpu.memory_space<vmem>>, vector<1x1xf32>
    %11 = vector.broadcast %10 : vector<1x1xf32> to vector<1x128xf32>
    %12 = arith.addf %9, %11 : vector<1x128xf32>
    %c0_11 = arith.constant 0 : index
    %c0_12 = arith.constant 0 : index
    %13 = vector.load %arg6[%c0_11, %c0_12] : memref<1x128xf32, #tpu.memory_space<vmem>>, vector<1x128xf32>
    tpu.vector_store %arg6[%c0_11, %c0_12], %12 {strides = array<i32>} : memref<1x128xf32, #tpu.memory_space<vmem>>, vector<1x128xf32>,
    return
  }
  func.func @transform_0(%arg0: i32) -> (i32, i32) {
    %c0_i32 = arith.constant 0 : i32
    %c0_i32_0 = arith.constant 0 : i32
    return %c0_i32, %arg0 : i32, i32
  }
  func.func @transform_1(%arg0: i32) -> (i32, i32) {
    %c0_i32 = arith.constant 0 : i32
    %c0_i32_0 = arith.constant 0 : i32
    %c0_i32_1 = arith.constant 0 : i32
    return %c0_i32, %c0_i32_0 : i32, i32
  }
  func.func @transform_2(%arg0: i32) -> (i32, i32) {
    %c0_i32 = arith.constant 0 : i32
    %c0_i32_0 = arith.constant 0 : i32
    %c0_i32_1 = arith.constant 0 : i32
    return %c0_i32, %c0_i32_0 : i32, i32
  }
  func.func @transform_3(%arg0: i32) -> (i32, i32) {
    %c0_i32 = arith.constant 0 : i32
    %c0_i32_0 = arith.constant 0 : i32
    %c0_i32_1 = arith.constant 0 : i32
    return %c0_i32, %c0_i32_0 : i32, i32
  }
  func.func @transform_4(%arg0: i32) -> (i32, i32) {
    %c0_i32 = arith.constant 0 : i32
    %c0_i32_0 = arith.constant 0 : i32
    %c0_i32_1 = arith.constant 0 : i32
    return %c0_i32, %c0_i32_0 : i32, i32
  }
  func.func @transform_5(%arg0: i32) -> (i32, i32) {
    %c0_i32 = arith.constant 0 : i32
    %c0_i32_0 = arith.constant 0 : i32
    return %c0_i32, %arg0 : i32, i32
  }
}

</mosaic_0001>

<bundles_post_ra>
// kernel: tpu_custom_call.1
= control target key start
LH: loop header
LB: loop body
LE: loop exit
PB: predicated region body
PF: predicated region fallthrough
CT: control target
= control target key end

     0   :  { %s789_s0 = inlined_call_operand.vmem [shape: f32[4,128], index: 0, kind: input, shape index: {}]   ;;  %s790_s1 = inlined_call_operand.vmem [shape: f32[128,4], index: 1, kind: input, shape index: {}]   ;;  %s791_s2 = inlined_call_operand.vmem [shape: f32[128,1], index: 2, kind: input, shape index: {}]   ;;  %s792_s3 = inlined_call_operand.vmem [shape: f32[1,128], index: 3, kind: input, shape index: {}]   ;;  %s793_s4 = inlined_call_operand.<no memory space> [shape: f32[1,1], index: 4, kind: input, shape index: {}]   ;;  %s794_s5 = inlined_call_operand.hbm [shape: f32[1,128], index: 5, kind: output, shape index: {}]  }
   0x1   :  { %v10_v0 = vstv %s793_s4 }
   0x2   :  { %11 = vst [vmem:[#allocation2] sm:$0x1] %v10_v0 }
   0x3   :  { %v23_v1 = vld [vmem:[%s789_s0] sm:$0xf]  ;;  %vm185_vm0 = vcmask 1043456   ;;  %vm136_vm1 = vcmask 31744   ;;  %v25_v3 = vld [vmem:[%s790_s1 + $0x8] sm:$0xff]  ;;  %v26_v4 = vld [vmem:[%s790_s1 + $0x10] sm:$0xff] }
   0x4   :  { %v24_v2 = vld [vmem:[%s790_s1] sm:$0xff]  ;;  %497 = vmatprep.subr.msk.mxu0 %vm185_vm0, %v23_v1  ;;  %v613_v5 = vmov 0   ;;  %v27_v6 = vld [vmem:[%s790_s1 + $0x18] sm:$0xff]  ;;  %v42_v9 = vld [vmem:[%s791_s2 + $0x10] sm:$0xff] }
   0x5   :  { %499 = vmatprep.mubr.msk.f32.mxu0 %vm136_vm1, %v24_v2  ;;  %498 = vmatpush3.msk.msra.mxu0 %vm185_vm0, %v23_v1  ;;  %v28_v7 = vld [vmem:[%s790_s1 + $0x20] sm:$0xff]  ;;  %v41_v10 = vld [vmem:[%s791_s2 + $0x8] sm:$0xff]  ;;  %v43_v12 = vld [vmem:[%s791_s2 + $0x18] sm:$0xff] }
   0x6   :  { %587 = vset.pattern.permute.xlu0 %v613_v5  ;;  %500 = vmatmul.mubr.msk.f32.vlgmr.msra.gmra.mrb[0].mxu0 %vm136_vm1, %v25_v3  ;;  %v40_v8 = vld [vmem:[%s791_s2] sm:$0xff]  ;;  %v29_v11 = vld [vmem:[%s790_s1 + $0x28] sm:$0xff]  ;;  %v30_v13 = vld [vmem:[%s790_s1 + $0x30] sm:$0xff] }
   0x7   :  { %588 = vset.pattern.permute.xlu1 %v613_v5  ;;  %502 = vmatprep.mubr.msk.f32.mxu0 %vm136_vm1, %v26_v4  ;;  %v44_v14 = vld [vmem:[%s791_s2 + $0x20] sm:$0xff] }
   0x8   :  { %58 = vperm.xlu0 %587, %v40_v8   ;;  %68 = vperm.xlu1 %588, %v42_v9  }
   0xa   :  { %503 = vmatmul.mubr.msk.f32.gmra.mrb[2].mxu0 %vm136_vm1, %v27_v6 }
   0xb   :  { %505 = vmatprep.mubr.msk.f32.mxu0 %vm136_vm1, %v28_v7 }
   0xc   :  { %63 = vperm.xlu0 %587, %v41_v10   ;;  %73 = vperm.xlu1 %588, %v43_v12  }
   0xe   :  { %506 = vmatmul.mubr.msk.f32.gmra.mrb[4].mxu0 %vm136_vm1, %v29_v11 }
   0xf   :  { %12 = vsyncpa [#allocation4], 0  ;;  %508 = vmatprep.mubr.msk.f32.mxu0 %vm136_vm1, %v30_v13  ;;  %v31_v15 = vld [vmem:[%s790_s1 + $0x38] sm:$0xff]  ;;  %v45_v16 = vld [vmem:[%s791_s2 + $0x28] sm:$0xff]  ;;  %v614_v36 = vmov 0.0|0.0   ;;  %vm615_vm2 = vmmov 0  }
  0x10   :  { %v32_v17 = vld [vmem:[%s790_s1 + $0x40] sm:$0xff]  ;;  %78 = vperm.xlu0 %587, %v44_v14   ;;  %v46_v18 = vld [vmem:[%s791_s2 + $0x30] sm:$0xff]  ;;  %83 = vperm.xlu1 %588, %v45_v16   ;;  %v33_v19 = vld [vmem:[%s790_s1 + $0x48] sm:$0xff]  ;;  %v616_v37 = vmov 0.0   ;;  %s617_s30 = smov [#allocation3]  }
  0x11   :  { %v47_v20 = vld [vmem:[%s791_s2 + $0x38] sm:$0xff]  ;;  %v34_v21 = vld [vmem:[%s790_s1 + $0x50] sm:$0xff]  ;;  %v48_v22 = vld [vmem:[%s791_s2 + $0x40] sm:$0xff]  ;;  %558 = vmatprep.subr.bf16.mxu1 %v614_v36  ;;  %555 = vmatprep.mubr.msk.f32.mxu1 %vm615_vm2, %v616_v37  ;;  %s438_s6 = sshll.u32 %s617_s30, 4  ;;  %s439_s6 = int_to_ptr.vmem [resolvable:$true] %s438_s6 }
  0x12   :  { %509 = vmatmul.mubr.msk.f32.gmra.mrb[6].mxu0 %vm136_vm1, %v31_v15  ;;  %v35_v23 = vld [vmem:[%s790_s1 + $0x58] sm:$0xff]  ;;  %v49_v24 = vld [vmem:[%s791_s2 + $0x48] sm:$0xff]  ;;  %v36_v25 = vld [vmem:[%s790_s1 + $0x60] sm:$0xff]  ;;  %s589_s7 = scalar_lea.vmem %s439_s6, 16  ;;  %s593_s8 = scalar_lea.vmem %s439_s6, 32 }
  0x13   :  { %511 = vmatprep.mubr.msk.f32.mxu0 %vm136_vm1, %v32_v17  ;;  %v50_v26 = vld [vmem:[%s791_s2 + $0x50] sm:$0xff]  ;;  %v37_v27 = vld [vmem:[%s790_s1 + $0x68] sm:$0xff]  ;;  %v51_v28 = vld [vmem:[%s791_s2 + $0x58] sm:$0xff]  ;;  %p590_p0 = scmp.ne.s32.totalorder %s439_s6, %s589_s7  ;;  %p594_p1 = scmp.lt.s32.totalorder %s439_s6, %s439_s6 }
  0x14   :  { %88 = vperm.xlu0 %587, %v46_v18   ;;  %93 = vperm.xlu1 %588, %v47_v20   ;;  %v38_v29 = vld [vmem:[%s790_s1 + $0x70] sm:$0xff]  ;;  %v52_v30 = vld [vmem:[%s791_s2 + $0x60] sm:$0xff]  ;;  %v39_v31 = vld [vmem:[%s790_s1 + $0x78] sm:$0xff]  ;;  %p595_p2 = scmp.lt.s32.totalorder %s593_s8, %s589_s7 }
  0x15   :  { %v53_v32 = vld [vmem:[%s791_s2 + $0x68] sm:$0xff]  ;;  %v54_v33 = vld [vmem:[%s791_s2 + $0x70] sm:$0xff]  ;;  %v55_v34 = vld [vmem:[%s791_s2 + $0x78] sm:$0xff] }
  0x16   :  { %512 = vmatmul.mubr.msk.f32.gmra.mrb[8].mxu0 %vm136_vm1, %v33_v19  ;;  %v351_v35 = vld [vmem:[#allocation2] sm:$0x1]  ;;  %p596_p3 = por %p595_p2, %p594_p1 }
  0x17   :  { %514 = vmatprep.mubr.msk.f32.mxu0 %vm136_vm1, %v34_v21 }
  0x18   :  { %98 = vperm.xlu0 %587, %v48_v22   ;;  %103 = vperm.xlu1 %588, %v49_v24   ;;  %p597_p4 = pnand %p596_p3, %p590_p0 }
  0x1a   :  { %515 = vmatmul.mubr.msk.f32.gmra.mrb[10].mxu0 %vm136_vm1, %v35_v23 }
  0x1b   :  { %517 = vmatprep.mubr.msk.f32.mxu0 %vm136_vm1, %v36_v25 }
  0x1c   :  { %108 = vperm.xlu0 %587, %v50_v26   ;;  %113 = vperm.xlu1 %588, %v51_v28  }
  0x1e   :  { %518 = vmatmul.mubr.msk.f32.gmra.mrb[12].mxu0 %vm136_vm1, %v37_v27 }
  0x1f   :  { %520 = vmatprep.mubr.msk.f32.mxu0 %vm136_vm1, %v38_v29 }
  0x20   :  { %118 = vperm.xlu0 %587, %v52_v30   ;;  %123 = vperm.xlu1 %588, %v53_v32  }
  0x22   :  { %521 = vmatmul.mubr.msk.f32.gmra.mrb[14].mxu0 %vm136_vm1, %v39_v31 }
  0x24   :  { %128 = vperm.xlu0 %587, %v54_v33   ;;  %133 = vperm.xlu1 %588, %v55_v34  }
  0x28   :  { %354 = vperm.xlu0 %587, %v351_v35  }
  0x87   :  { %v69_v38 = vpop.permute.xlu1 %68  ;;  %v59_v39 = vpop.permute.xlu0 %58 }
  0x8b   :  { %v74_v40 = vpop.permute.xlu1 %73  ;;  %v64_v41 = vpop.permute.xlu0 %63 }
  0x8f   :  { %v84_v42 = vpop.permute.xlu1 %83  ;;  %v79_v43 = vpop.permute.xlu0 %78 }
  0x93   :  { %v94_v49 = vpop.permute.xlu1 %93  ;;  %v89_v52 = vpop.permute.xlu0 %88 }
  0x97   :  { %v104_v62 = vpop.permute.xlu1 %103  ;;  %v99_v1 = vpop.permute.xlu0 %98 }
  0x9b   :  { %v114_v10 = vpop.permute.xlu1 %113  ;;  %v109_v13 = vpop.permute.xlu0 %108 }
  0x9f   :  { %v124_v23 = vpop.permute.xlu1 %123  ;;  %v119_v26 = vpop.permute.xlu0 %118 }
  0xa3   :  { %v134_v35 = vpop.permute.xlu1 %133 }
  0xd9   :  { %v501_v44 = vpop.f32.mrb[0].mxu0 }
  0xda   :  { %v261_v45 = vadd.f32 %v501_v44, %v64_v41  ;;  %v255_v46 = vpop.f32.mrb[1].mxu0 }
  0xdb   :  { %v256_v47 = vadd.f32 %v255_v46, %v59_v39  ;;  %v129_v39 = vpop.permute.xlu0 %128 }
  0xdc   :  { %v335_v48 = vmax.f32 %v261_v45, 0.0 }
  0xdd   :  { %v334_v50 = vmax.f32 %v256_v47, 0.0  ;;  %v504_v51 = vpop.f32.mrb[2].mxu0  ;;  %v350_v47 = vld [vmem:[%s792_s3] sm:$0x1] }
  0xde   :  { %v271_v53 = vadd.f32 %v504_v51, %v74_v40  ;;  %v265_v54 = vpop.f32.mrb[3].mxu0 }
  0xdf   :  { %v266_v55 = vadd.f32 %v265_v54, %v69_v38  ;;  %v559_v56 = vpack.c.bf16 %v335_v48, %v334_v50  ;;  %v357_v48 = vlaneseq  ;;  %v355_v51 = vpop.permute.xlu0 %354 }
  0xe0   :  { %v337_v57 = vmax.f32 %v271_v53, 0.0 }
  0xe1   :  { %v336_v58 = vmax.f32 %v266_v55, 0.0  ;;  %v507_v59 = vpop.f32.mrb[4].mxu0  ;;  %560 = vmatpush3.bf16.msra.mxu1 %v559_v56 }
  0xe2   :  { %v281_v60 = vadd.f32 %v507_v59, %v84_v42  ;;  %v275_v61 = vpop.f32.mrb[5].mxu0  ;;  %561 = vmatprep.subr.bf16.mxu1 %v614_v36 }
  0xe3   :  { %v562_v63 = vpack.c.bf16 %v337_v57, %v336_v58  ;;  %v276_v0 = vadd.f32 %v275_v61, %v79_v43 }
  0xe4   :  { %v339_v2 = vmax.f32 %v281_v60, 0.0 }
  0xe5   :  { %v338_v3 = vmax.f32 %v276_v0, 0.0  ;;  %v510_v4 = vpop.f32.mrb[6].mxu0  ;;  %563 = vmatpush3.bf16.msra.mxu1 %v562_v63 }
  0xe6   :  { %v291_v5 = vadd.f32 %v510_v4, %v94_v49  ;;  %v285_v6 = vpop.f32.mrb[7].mxu0  ;;  %564 = vmatprep.subr.bf16.mxu1 %v614_v36  ;;  %v358_v49 = vshrl.u32 %v357_v48, 7 }
  0xe7   :  { %v565_v7 = vpack.c.bf16 %v339_v2, %v338_v3  ;;  %v286_v8 = vadd.f32 %v285_v6, %v89_v52 }
  0xe8   :  { %v341_v9 = vmax.f32 %v291_v5, 0.0  ;;  %v359_v50 = vsub.s32 0, %v358_v49 }
  0xe9   :  { %v340_v11 = vmax.f32 %v286_v8, 0.0  ;;  %v513_v12 = vpop.f32.mrb[8].mxu0  ;;  %566 = vmatpush3.bf16.msra.mxu1 %v565_v7 }
  0xea   :  { %v301_v14 = vadd.f32 %v513_v12, %v104_v62  ;;  %v295_v15 = vpop.f32.mrb[9].mxu0  ;;  %567 = vmatprep.subr.bf16.mxu1 %v614_v36  ;;  %v360_v52 = vrot.slane %v355_v51, %v359_v50 }
  0xeb   :  { %v568_v16 = vpack.c.bf16 %v341_v9, %v340_v11  ;;  %v296_v17 = vadd.f32 %v295_v15, %v99_v1 }
  0xec   :  { %v343_v18 = vmax.f32 %v301_v14, 0.0 }
  0xed   :  { %v342_v19 = vmax.f32 %v296_v17, 0.0  ;;  %v516_v20 = vpop.f32.mrb[10].mxu0  ;;  %569 = vmatpush3.bf16.msra.mxu1 %v568_v16 }
  0xee   :  { %v311_v21 = vadd.f32 %v516_v20, %v114_v10  ;;  %v305_v22 = vpop.f32.mrb[11].mxu0  ;;  %570 = vmatprep.subr.bf16.mxu1 %v614_v36 }
  0xef   :  { %v571_v24 = vpack.c.bf16 %v343_v18, %v342_v19  ;;  %v306_v25 = vadd.f32 %v305_v22, %v109_v13 }
  0xf0   :  { %v345_v27 = vmax.f32 %v311_v21, 0.0 }
  0xf1   :  { %v344_v28 = vmax.f32 %v306_v25, 0.0  ;;  %v519_v29 = vpop.f32.mrb[12].mxu0  ;;  %572 = vmatpush3.bf16.msra.mxu1 %v571_v24 }
  0xf2   :  { %v321_v30 = vadd.f32 %v519_v29, %v124_v23  ;;  %v315_v31 = vpop.f32.mrb[13].mxu0  ;;  %573 = vmatprep.subr.bf16.mxu1 %v614_v36 }
  0xf3   :  { %v574_v32 = vpack.c.bf16 %v345_v27, %v344_v28  ;;  %v316_v33 = vadd.f32 %v315_v31, %v119_v26 }
  0xf4   :  { %v347_v34 = vmax.f32 %v321_v30, 0.0 }
  0xf5   :  { %v346_v37 = vmax.f32 %v316_v33, 0.0  ;;  %v522_v38 = vpop.f32.mrb[14].mxu0  ;;  %575 = vmatpush3.bf16.msra.mxu1 %v574_v32 }
  0xf6   :  { %v331_v40 = vadd.f32 %v522_v38, %v134_v35  ;;  %v325_v41 = vpop.f32.mrb[15].mxu0  ;;  %576 = vmatprep.subr.bf16.mxu1 %v614_v36 }
  0xf7   :  { %v577_v42 = vpack.c.bf16 %v347_v34, %v346_v37  ;;  %v326_v43 = vadd.f32 %v325_v41, %v129_v39 }
  0xf8   :  { %v349_v44 = vmax.f32 %v331_v40, 0.0 }
  0xf9   :  { %v348_v45 = vmax.f32 %v326_v43, 0.0  ;;  %578 = vmatpush3.bf16.msra.mxu1 %v577_v42 }
  0xfa   :  { %579 = vmatprep.subr.bf16.mxu1 %v614_v36 }
  0xfb   :  { %v580_v46 = vpack.c.bf16 %v349_v44, %v348_v45 }
  0xfd   :  { %581 = vmatpush3.bf16.msra.mxu1 %v580_v46 }
 0x100   :  { %556 = vmatmul.mubr.f32.vlgmr.msra.gmra.mrb[0].mxu1 %v350_v47 }
 0x1d3   :  { %v427_v53 = vpop.f32.mrb[0].mxu1 }
 0x1d4   :  { %v428_v54 = vadd.f32 %v427_v53, %v360_v52  ;;  %v557_v55 = vpop.f32.mrb[1].mxu1 }
 0x1d6   :  { %431 = vst [vmem:[#allocation3] sm:$0x1] %v428_v54 }
 0x1d7   :  { %600 = shalt.err (!%p597_p4)
}
 0x1d8   :  { %s601_s10 = scalar_lea.hbm %s794_s5, 16 }
 0x1d9   :  { %p602_p5 = scmp.ne.s32.totalorder %s794_s5, %s601_s10  ;;  %p605_p6 = scmp.lt.u32.totalorder %s601_s10, %s794_s5 }
 0x1db   :  { %p607_p7 = pnand %p605_p6, %p602_p5 }
 0x1dd   :  { %610 = shalt.err (!%p607_p7)
}
 0x1de   :  { %441 = dma.vmem_to_hbm [thread:$0]  %s439_s6, 16, %s794_s5, [#allocation4]  }
 0x1df   :  { %611 = dma.done.wait [#allocation4], 16  }
 0x1e0   :  { %612 = vsyncadd [#allocation4], 4294967280 }
 0x1e1   :  { %445 = vsyncpa [#allocation4], 1 }

</bundles_post_ra>
